<compile_context>
chip_gen: v5e
topology: v5e:2x2
jax: 0.10.0
libtpu: 0.0.40
codegen_flags: <defaults>
</compile_context>

<pallas_src>
import jax
import jax.numpy as jnp
from jax.experimental import pallas as pl
from jax.experimental.pallas import tpu as pltpu


def linear_kernel(x_ref, p_ref, o_ref):
    # x_ref: (2, 3) f32
    # p_ref: (4, 4) f32 -- rows 0..2 = weight in (in_features, out_features)
    #                      layout, row 3 = bias.  Packed at init time.
    x = x_ref[...]
    w = p_ref[0:3, :]                      # (3, 4) static sublane slice
    b = p_ref[3:4, :]                      # (1, 4) static sublane slice
    # One MXU push/pop; avoids the lane-broadcast relayouts of a per-k
    # VPU FMA.  M=2, K=3, N=4 pads into a single systolic pass.
    y = jnp.dot(x, w, preferred_element_type=jnp.float32) + b
    o_ref[...] = y.astype(o_ref.dtype)


@jax.jit
def model_forward(x, packed):
    """x: (2, 3) f32; packed: (4, 4) f32 = [W^T (3,4); b (1,4)]."""
    y = pl.pallas_call(
        linear_kernel,
        out_shape=jax.ShapeDtypeStruct((x.shape[0], packed.shape[1]), x.dtype),
        in_specs=[
            pl.BlockSpec(memory_space=pltpu.MemorySpace.VMEM),
            pl.BlockSpec(memory_space=pltpu.MemorySpace.VMEM),
        ],
        out_specs=pl.BlockSpec(memory_space=pltpu.MemorySpace.VMEM),
        # 2*M*K*N = 48 flops; bytes = x(24) + packed(64) + out(32) = 120.
        cost_estimate=pl.CostEstimate(flops=48, bytes_accessed=120,
                                      transcendentals=0),
    )(x, packed)

    # Contiguous row-major (2,4) -> (2,2,2): metadata-only bitcast in XLA.
    # (See TODO above about the invalid (2, 2) target in the original module.)
    return jnp.reshape(y, (2, 2, 2))


if __name__ == "__main__":
    key = jax.random.PRNGKey(0)
    kx, kw, kb = jax.random.split(key, 3)

    # Input consistent with the module: x = torch.randn(2, 3)
    x = jax.random.normal(kx, (2, 3), dtype=jnp.float32)

    # nn.Linear(3, 4) parameters in PyTorch layout (uniform +/- 1/sqrt(in)).
    bound = 1.0 / jnp.sqrt(3.0)
    weight = jax.random.uniform(kw, (4, 3), dtype=jnp.float32,
                                minval=-bound, maxval=bound)   # (out, in)
    bias = jax.random.uniform(kb, (4,), dtype=jnp.float32,
                              minval=-bound, maxval=bound)     # (out,)

    # Init-time (one-off) layout prep: pack W^T and bias into one (4,4) buffer
    # so the hot forward path has exactly two input DMAs and no transpose /
    # reshape HLOs around the custom call.
    packed = jnp.concatenate(
        [weight.T, jnp.reshape(bias, (1, 4))], axis=0)          # (4, 4)

    out = model_forward(x, packed)
    jax.block_until_ready(out)

    # Sanity check against plain-JAX reference of the PyTorch semantics.
    ref = jnp.reshape(x @ weight.T + bias, (2, 2, 2))
    assert jnp.allclose(out, ref, atol=1e-5, rtol=1e-5)

    print("KERNEL_OK")
</pallas_src>

<mosaic_0001>
module attributes {stable_mosaic.version = 11 : i64} {
  func.func @linear_kernel(%arg0: memref<2x3xf32, #tpu.memory_space<vmem>>, %arg1: memref<4x4xf32, #tpu.memory_space<vmem>>, %arg2: memref<2x4xf32, #tpu.memory_space<vmem>>) attributes {dimension_semantics = [], scalar_prefetch = 0 : i64, scratch_operands = 0 : i64, tpu.core_type = #tpu.core_type<tc>} {
    %c0 = arith.constant 0 : index
    %c0_0 = arith.constant 0 : index
    %0 = vector.load %arg0[%c0, %c0_0] : memref<2x3xf32, #tpu.memory_space<vmem>>, vector<2x3xf32>
    %c0_1 = arith.constant 0 : index
    %c0_2 = arith.constant 0 : index
    %1 = vector.load %arg1[%c0_1, %c0_2] : memref<4x4xf32, #tpu.memory_space<vmem>>, vector<3x4xf32>
    %c3 = arith.constant 3 : index
    %c0_3 = arith.constant 0 : index
    %2 = vector.load %arg1[%c3, %c0_3] : memref<4x4xf32, #tpu.memory_space<vmem>>, vector<1x4xf32>
    %cst = arith.constant dense<0.000000e+00> : vector<2x4xf32>
    %3 = tpu.matmul %0, %1, %cst {dimension_numbers = #tpu.dot_dimension_numbers<[1], [0], [0], [1], [0, 0, 1, 1], [], []>} : vector<2x3xf32>, vector<3x4xf32>, vector<2x4xf32> -> vector<2x4xf32>
    %4 = vector.broadcast %2 : vector<1x4xf32> to vector<2x4xf32>
    %5 = arith.addf %3, %4 : vector<2x4xf32>
    %c0_4 = arith.constant 0 : index
    %c0_5 = arith.constant 0 : index
    %6 = vector.load %arg2[%c0_4, %c0_5] : memref<2x4xf32, #tpu.memory_space<vmem>>, vector<2x4xf32>
    tpu.vector_store %arg2[%c0_4, %c0_5], %5 {strides = array<i32>} : memref<2x4xf32, #tpu.memory_space<vmem>>, vector<2x4xf32>,
    return
  }
}

</mosaic_0001>

<bundles_post_ra>
// kernel: model_forward.1
= control target key start
LH: loop header
LB: loop body
LE: loop exit
PB: predicated region body
PF: predicated region fallthrough
CT: control target
= control target key end

     0   :  { %7 = vsyncpa [#allocation3], 0  ;;  %s162_s0 = inlined_call_operand.hbm [shape: f32[2,3], index: 0, kind: input, shape index: {}]   ;;  %s163_s1 = inlined_call_operand.hbm [shape: f32[4,4], index: 1, kind: input, shape index: {}]   ;;  %s164_s2 = inlined_call_operand.vmem [shape: f32[2,4], index: 2, kind: output, shape index: {}]  }
   0x1   :  { %s14_s11 = sshll.u32 %s162_s0, 4  ;;  %s15_s11 = int_to_ptr.hbm [resolvable:$true] %s14_s11 }
   0x2   :  { %8 = vsyncpa [#allocation5], 0  ;;  %s136_s12 = smov [#allocation2]   ;;  %s25_s16 = sshll.u32 %s163_s1, 4  ;;  %s26_s16 = int_to_ptr.hbm [resolvable:$true] %s25_s16 }
   0x3   :  { %s16_s13 = sshll.u32 %s136_s12, 4  ;;  %s137_s17 = smov [#allocation4]   ;;  %s17_s13 = int_to_ptr.vmem [resolvable:$true] %s16_s13 }
   0x4   :  { %19 = dma.hbm_to_vmem [thread:$0]  %s15_s11, 32, %s17_s13, [#allocation3]  }
   0x5   :  { %s27_s18 = sshll.u32 %s137_s17, 4  ;;  %s28_s18 = int_to_ptr.vmem [resolvable:$true] %s27_s18 }
   0x6   :  { %30 = dma.hbm_to_vmem [thread:$0]  %s26_s16, 64, %s28_s18, [#allocation5]  }
   0x7   :  { %132 = dma.done.wait [#allocation3], 32  }
   0x8   :  { %133 = vsyncadd [#allocation3], 4294967264 }
   0x9   :  { %134 = dma.done.wait [#allocation5], 64  }
   0xa   :  { %135 = vsyncadd [#allocation5], 4294967232  ;;  %vm47_vm0 = vcmask 1042432   ;;  %vm43_vm1 = vcmask 23552   ;;  %v40_v0 = vld [vmem:[#allocation4] sm:$0x7] }
   0xb   :  { %v39_v1 = vld [vmem:[#allocation2] sm:$0x3]  ;;  %79 = vmatpush.msk.msra.mxu0 %vm47_vm0, %v40_v0  ;;  %v83_v2 = vld [vmem:[#allocation4 + $0x3] ss:$0 sm:$0xff]  ;;  %vm71_vm2 = vcmask 25600  }
   0xc   :  { %80 = vmatmul.msk.f32.vlgmr.msra.gmra.mxu0 %vm43_vm1, %v39_v1 }
  0x89   :  { %v68_v3 = vpop.f32.mrf.mxu0 }
  0x8a   :  { %v69_v4 = vadd.f32 %v83_v2, %v68_v3 }
  0x8c   :  { %72 = vst.msk [vmem:[%s164_s2] sm:$0x3] %vm71_vm2, %v69_v4 }
  0x8d   :  { %77 = vsyncpa [#allocation3], 1 }
  0x8e   :  { %78 = vsyncpa [#allocation5], 1 }

</bundles_post_ra>
